<compile_context>
chip_gen: v5e
topology: v5e:2x2
jax: 0.10.0
libtpu: 0.0.40
codegen_flags: <defaults>
</compile_context>

<pallas_src>
import math

import jax
import jax.numpy as jnp
from jax.experimental import pallas as pl
from jax.experimental.pallas import tpu as pltpu


# ----------------------------------------------------------------------------- helpers

def _bilinear_up_matrix(size_in, stride=8, ksize=16, pad=4):
    """1-D upsampling matrix equivalent to the fixed bilinear ConvTranspose kernel.

    fill_up_weights() is separable: w[i, j] = k1d[i] * k1d[j], so the depthwise
    ConvTranspose2d(16, stride=8, padding=4) is exactly Y_c = U_h @ X_c @ U_w^T with
    U[o, i] = k1d[o - stride*i + pad] when that index is valid.
    """
    f = math.ceil(ksize / 2)
    c = (2 * f - 1 - f % 2) / (2.0 * f)
    k1d = jnp.array([1.0 - abs(i / f - c) for i in range(ksize)], dtype=jnp.float32)
    size_out = stride * size_in
    oy = jnp.arange(size_out)[:, None]            # (size_out, 1)
    iy = jnp.arange(size_in)[None, :]             # (1, size_in)
    ky = oy - stride * iy + pad                   # kernel tap feeding output oy from input iy
    valid = (ky >= 0) & (ky < ksize)
    U = jnp.where(valid, k1d[jnp.clip(ky, 0, ksize - 1)], 0.0)
    return U.astype(jnp.float32)                  # (size_out, size_in)


def _default_vmem_budget():
    """Per-step VMEM budget: ~1/4 of physical VMEM, clamped to [12, 48] MiB."""
    try:
        cap = pltpu.get_tpu_info().vmem_capacity_bytes
    except Exception:  # e.g. interpret mode / unknown chip
        cap = 64 * 2 ** 20
    return int(min(max(cap // 4, 12 * 2 ** 20), 48 * 2 ** 20))


def _vmem_limit(footprint_bytes):
    """Explicit scoped-VMEM limit: 2x the estimated footprint, clamped to [32, 64] MiB."""
    return int(min(64 * 2 ** 20, max(32 * 2 ** 20, 2 * int(footprint_bytes))))


def _seg_footprint(C_in, K, tile_s, elt_bytes):
    # double-buffered x & xseg blocks + f32 matmul temp + weights/bias
    return (2 * C_in * tile_s * elt_bytes + 2 * K * tile_s * elt_bytes
            + K * tile_s * 4 + 2 * K * C_in * elt_bytes + 2 * K * 4)


def _pick_tile_s(HW, C_in, K, elt_bytes, budget):
    """Largest lane-legal (multiple of 128, or full) divisor of HW under the budget."""
    best = None
    for d in range(1, HW + 1):
        if HW % d:
            continue
        if d != HW and d % 128:
            continue
        if _seg_footprint(C_in, K, d, elt_bytes) <= budget:
            best = d
    if best is None:
        best = HW if HW % 128 else 128
    return best


def _up_footprint(K, H, W, tile_h, stride, elt_bytes, out_bytes):
    tile_hout = stride * tile_h
    W_out = stride * W
    y_f32 = K * tile_hout * W_out * 4           # f32 logits from the W-stage matmul
    z_f32 = K * tile_hout * W_out * 4           # one elementwise f32 temp (z / exp)
    out_blk = 2 * K * tile_hout * W_out * out_bytes   # double-buffered logy block
    tmp_f32 = K * W * tile_hout * 4             # H-stage result
    uh_blk = 2 * tile_hout * H * elt_bytes
    uw_blk = 2 * (stride * W) * W * elt_bytes
    seg_blk = 2 * K * H * W * elt_bytes
    return y_f32 + z_f32 + out_blk + tmp_f32 + uh_blk + uw_blk + seg_blk


def _pick_tile_h(H, W, K, stride, elt_bytes, out_bytes, budget):
    best = 1
    for d in range(1, H + 1):
        if H % d:
            continue
        if _up_footprint(K, H, W, d, stride, elt_bytes, out_bytes) <= budget:
            best = d
    # NOTE: for feature-map heights with awkward factors this can fall back to tile_h=1
    # (tile_hout=8); functionally fine, writeback efficiency suffers.
    return best


# ----------------------------------------------------------------------------- kernels

def seg_conv_kernel(x_ref, w_ref, b_ref, xseg_ref):
    # x_ref:    (1, C_in, tile_s)  backbone feature map slab (lane-dense)
    # w_ref:    (K, C_in)          seg 1x1-conv weight
    # b_ref:    (K, 1)             seg bias (f32)
    # xseg_ref: (1, K, tile_s)     seg(x) slab (lane-dense)
    seg = jax.lax.dot_general(                       # (K, tile_s), f32 accumulation
        w_ref[...], x_ref[0],
        dimension_numbers=(((1,), (0,)), ((), ())),
        preferred_element_type=jnp.float32)
    xseg_ref[0] = (seg + b_ref[...]).astype(xseg_ref.dtype)


def up_logsoftmax_kernel(seg_ref, uh_ref, uw_ref, logy_ref):
    # seg_ref:  (1, K, H, W)              seg(x) for this sample (small, resident)
    # uh_ref:   (tile_hout, H)            rows of the 1-D bilinear up-matrix for this tile
    # uw_ref:   (W_out, W)                1-D bilinear up-matrix (cols)
    # logy_ref: (1, K, tile_hout, W_out)  log-softmax(up(seg(x))) slab
    seg3 = seg_ref[0]                                # (K, H, W)
    uh = uh_ref[...]                                 # (tile_hout, H)
    uw = uw_ref[...]                                 # (W_out, W)

    # Separable depthwise ConvTranspose2d(16, stride=8, pad=4): contract H first, then W,
    # so the result lands directly in (K, tile_hout, W_out) layout (no large transpose).
    tmp = jax.lax.dot_general(                       # (K, W, tile_hout)
        seg3, uh, dimension_numbers=(((1,), (1,)), ((), ())),
        preferred_element_type=jnp.float32)
    y = jax.lax.dot_general(                         # (K, tile_hout, W_out)
        tmp.astype(uw.dtype), uw,
        dimension_numbers=(((1,), (1,)), ((), ())),
        preferred_element_type=jnp.float32)

    # LogSoftmax over the class axis (axis 0 here), stabilized, f32.
    m = jnp.max(y, axis=0, keepdims=True)
    z = y - m
    lse = jnp.log(jnp.sum(jnp.exp(z), axis=0, keepdims=True))
    logy_ref[0] = (z - lse).astype(logy_ref.dtype)


# ----------------------------------------------------------------------------- wrapper

def drnseg_forward(x, w_seg, b_seg, *, stride=8, tile_h=None,
                   out_dtype=jnp.bfloat16, compute_dtype=jnp.bfloat16,
                   vmem_budget_bytes=None):
    N, C_in, H, W = x.shape
    K = w_seg.shape[0]
    H_out, W_out = stride * H, stride * W
    HW = H * W

    elt_bytes = jnp.dtype(compute_dtype).itemsize
    out_bytes = jnp.dtype(out_dtype).itemsize
    if vmem_budget_bytes is None:
        vmem_budget_bytes = _default_vmem_budget()

    # ---------------- stage 1: self.seg — 1x1 Conv2d as a channel matmul ----------------
    tile_s = _pick_tile_s(HW, C_in, K, elt_bytes, vmem_budget_bytes)
    n_sp = HW // tile_s
    w2 = w_seg.reshape(K, C_in).astype(compute_dtype)
    b2 = b_seg.reshape(K, 1).astype(jnp.float32)
    x2 = x.reshape(N, C_in, HW).astype(compute_dtype)   # lane-dense; reshape free in HBM

    seg_fp = _seg_footprint(C_in, K, tile_s, elt_bytes)
    xseg = pl.pallas_call(
        seg_conv_kernel,
        out_shape=jax.ShapeDtypeStruct((N, K, HW), compute_dtype),
        grid_spec=pltpu.PrefetchScalarGridSpec(
            num_scalar_prefetch=0,
            grid=(N, n_sp),
            in_specs=[
                pl.BlockSpec((1, C_in, tile_s), lambda n, s: (n, 0, s)),
                pl.BlockSpec((K, C_in), lambda n, s: (0, 0)),
                pl.BlockSpec((K, 1), lambda n, s: (0, 0)),
            ],
            out_specs=pl.BlockSpec((1, K, tile_s), lambda n, s: (n, 0, s)),
        ),
        compiler_params=pltpu.CompilerParams(
            dimension_semantics=("parallel", "parallel"),
            vmem_limit_bytes=_vmem_limit(seg_fp)),
        cost_estimate=pl.CostEstimate(
            flops=int(2 * N * K * C_in * HW),
            transcendentals=0,
            bytes_accessed=int(N * C_in * HW * elt_bytes + N * K * HW * elt_bytes
                               + K * C_in * elt_bytes)),
    )(x2, w2, b2)

    seg4 = xseg.reshape(N, K, H, W)                  # free relayout in HBM

    # -------- stage 2: self.up (separable bilinear x8) + self.softmax (LogSoftmax) -------
    if tile_h is None:
        tile_h = _pick_tile_h(H, W, K, stride, elt_bytes, out_bytes, vmem_budget_bytes)
    assert H % tile_h == 0, (H, tile_h)
    tile_hout = stride * tile_h
    n_tiles = H // tile_h

    uh = _bilinear_up_matrix(H, stride=stride).astype(compute_dtype)   # exact in bf16
    uw = _bilinear_up_matrix(W, stride=stride).astype(compute_dtype)

    up_fp = _up_footprint(K, H, W, tile_h, stride, elt_bytes, out_bytes)
    logy = pl.pallas_call(
        up_logsoftmax_kernel,
        out_shape=jax.ShapeDtypeStruct((N, K, H_out, W_out), out_dtype),
        grid_spec=pltpu.PrefetchScalarGridSpec(
            num_scalar_prefetch=0,
            grid=(N, n_tiles),
            in_specs=[
                pl.BlockSpec((1, K, H, W), lambda n, t: (n, 0, 0, 0)),   # small, resident
                pl.BlockSpec((tile_hout, H), lambda n, t: (t, 0)),       # per-tile uh rows
                pl.BlockSpec((W_out, W), lambda n, t: (0, 0)),
            ],
            out_specs=pl.BlockSpec((1, K, tile_hout, W_out), lambda n, t: (n, 0, t, 0)),
        ),
        compiler_params=pltpu.CompilerParams(
            # Every step is independent -> shard both axes across cores (v7x megacore).
            dimension_semantics=("parallel", "parallel"),
            vmem_limit_bytes=_vmem_limit(up_fp)),
        cost_estimate=pl.CostEstimate(
            flops=int(2 * N * K * (H_out * H * W + H_out * W_out * W)),
            transcendentals=int(N * K * H_out * W_out),
            bytes_accessed=int(N * n_tiles * K * H * W * elt_bytes
                               + N * K * H_out * W_out * out_bytes
                               + (H_out * H + W_out * W) * elt_bytes)),
    )(seg4, uh, uw)

    return logy, seg4


# ----------------------------------------------------------------------------- reference

def _reference_forward(x, w_seg, b_seg, stride=8):
    xf = x.astype(jnp.float32)
    wf = w_seg.astype(jnp.float32)
    bf = b_seg.astype(jnp.float32)
    seg = jnp.einsum("kc,nchw->nkhw", wf, xf) + bf[None, :, None, None]
    uh = _bilinear_up_matrix(x.shape[2], stride=stride)
    uw = _bilinear_up_matrix(x.shape[3], stride=stride)
    y = jnp.einsum("Oh,nkhw,Pw->nkOP", uh, seg, uw)
    return jax.nn.log_softmax(y, axis=1), seg


if __name__ == "__main__":
    # Small synthetic shapes: base() feature map with out_dim=4 channels, 16x16 spatial.
    N, C_in, H, W = 2, 4, 16, 16
    classes = 4

    key = jax.random.PRNGKey(0)
    k_x, k_w = jax.random.split(key)

    # Backbone output in bf16 (as a realistic DRN backbone would emit).
    x = jax.random.normal(k_x, (N, C_in, H, W), dtype=jnp.float32).astype(jnp.bfloat16)

    # self.seg init: weight ~ N(0, sqrt(2/n)) with n = kh*kw*out_channels; bias zeroed.
    n_fan = 1 * 1 * classes
    w_seg = (jax.random.normal(k_w, (classes, C_in), dtype=jnp.float32)
             * math.sqrt(2.0 / n_fan)).astype(jnp.bfloat16)
    b_seg = jnp.zeros((classes,), dtype=jnp.bfloat16)

    # tile_h=8 -> tile_hout=64, 2 output-row tiles per sample (exercises the tiled path).
    log_softmax_y, x_seg = drnseg_forward(x, w_seg, b_seg, tile_h=8)
    jax.block_until_ready((log_softmax_y, x_seg))

    assert log_softmax_y.shape == (N, classes, 8 * H, 8 * W)
    assert x_seg.shape == (N, classes, H, W)

    # Numerical sanity check vs. pure-JAX reference (bf16 outputs -> loose tolerance).
    ref_logy, ref_seg = _reference_forward(x, w_seg, b_seg)
    err_logy = float(jnp.max(jnp.abs(log_softmax_y.astype(jnp.float32) - ref_logy)))
    err_seg = float(jnp.max(jnp.abs(x_seg.astype(jnp.float32) - ref_seg)))
    assert err_logy < 0.3, f"log-softmax mismatch vs reference: {err_logy}"
    assert err_seg < 0.15, f"seg feature mismatch vs reference: {err_seg}"

    print("KERNEL_OK")
</pallas_src>

<mosaic_0001>
module attributes {stable_mosaic.version = 11 : i64} {
  func.func @seg_conv_kernel(%arg0: i32, %arg1: i32, %arg2: memref<1x4x256xbf16, #tpu.memory_space<vmem>>, %arg3: memref<4x4xbf16, #tpu.memory_space<vmem>>, %arg4: memref<4x1xf32, #tpu.memory_space<vmem>>, %arg5: memref<1x4x256xbf16, #tpu.memory_space<vmem>>) attributes {dimension_semantics = [#tpu.dimension_semantics<parallel>, #tpu.dimension_semantics<parallel>], iteration_bounds = array<i64: 2, 1>, scalar_prefetch = 0 : i64, scratch_operands = 0 : i64, tpu.core_type = #tpu.core_type<tc>, window_params = [{transform_indices = @transform_0, window_bounds = array<i64: 1, 4, 256>}, {pipeline_mode = #tpu.pipeline_mode<synchronous>, transform_indices = @transform_1, window_bounds = array<i64: 4, 4>}, {pipeline_mode = #tpu.pipeline_mode<synchronous>, transform_indices = @transform_2, window_bounds = array<i64: 4, 1>}, {transform_indices = @transform_3, window_bounds = array<i64: 1, 4, 256>}]} {
    %c0 = arith.constant 0 : index
    %c0_0 = arith.constant 0 : index
    %0 = vector.load %arg3[%c0, %c0_0] : memref<4x4xbf16, #tpu.memory_space<vmem>>, vector<4x4xbf16>
    %c0_1 = arith.constant 0 : index
    %c0_2 = arith.constant 0 : index
    %c0_3 = arith.constant 0 : index
    %1 = vector.load %arg2[%c0_1, %c0_2, %c0_3] : memref<1x4x256xbf16, #tpu.memory_space<vmem>>, vector<1x4x256xbf16>
    %2 = vector.shape_cast %1 : vector<1x4x256xbf16> to vector<4x256xbf16>
    %cst = arith.constant dense<0.000000e+00> : vector<4x256xf32>
    %3 = tpu.matmul %0, %2, %cst {dimension_numbers = #tpu.dot_dimension_numbers<[1], [0], [0], [1], [0, 0, 1, 1], [], []>} : vector<4x4xbf16>, vector<4x256xbf16>, vector<4x256xf32> -> vector<4x256xf32>
    %c0_4 = arith.constant 0 : index
    %c0_5 = arith.constant 0 : index
    %4 = vector.load %arg4[%c0_4, %c0_5] : memref<4x1xf32, #tpu.memory_space<vmem>>, vector<4x1xf32>
    %5 = vector.broadcast %4 : vector<4x1xf32> to vector<4x256xf32>
    %6 = arith.addf %3, %5 : vector<4x256xf32>
    %7 = arith.truncf %6 : vector<4x256xf32> to vector<4x256xbf16>
    %c0_6 = arith.constant 0 : index
    %c0_7 = arith.constant 0 : index
    %c0_8 = arith.constant 0 : index
    %8 = vector.load %arg5[%c0_6, %c0_7, %c0_8] : memref<1x4x256xbf16, #tpu.memory_space<vmem>>, vector<1x4x256xbf16>
    %9 = vector.shape_cast %8 : vector<1x4x256xbf16> to vector<4x256xbf16>
    %10 = vector.shape_cast %7 : vector<4x256xbf16> to vector<1x4x256xbf16>
    tpu.vector_store %arg5[%c0_6, %c0_7, %c0_8], %10 {strides = array<i32>} : memref<1x4x256xbf16, #tpu.memory_space<vmem>>, vector<1x4x256xbf16>,
    return
  }
  func.func @transform_0(%arg0: i32, %arg1: i32) -> (i32, i32, i32) {
    %c0_i32 = arith.constant 0 : i32
    %c0_i32_0 = arith.constant 0 : i32
    return %arg0, %c0_i32, %arg1 : i32, i32, i32
  }
  func.func @transform_1(%arg0: i32, %arg1: i32) -> (i32, i32) {
    %c0_i32 = arith.constant 0 : i32
    %c0_i32_0 = arith.constant 0 : i32
    %c0_i32_1 = arith.constant 0 : i32
    return %c0_i32, %c0_i32_0 : i32, i32
  }
  func.func @transform_2(%arg0: i32, %arg1: i32) -> (i32, i32) {
    %c0_i32 = arith.constant 0 : i32
    %c0_i32_0 = arith.constant 0 : i32
    %c0_i32_1 = arith.constant 0 : i32
    return %c0_i32, %c0_i32_0 : i32, i32
  }
  func.func @transform_3(%arg0: i32, %arg1: i32) -> (i32, i32, i32) {
    %c0_i32 = arith.constant 0 : i32
    %c0_i32_0 = arith.constant 0 : i32
    return %arg0, %c0_i32, %arg1 : i32, i32, i32
  }
}

</mosaic_0001>

<bundles_post_ra>
// kernel: tpu_custom_call.1
= control target key start
LH: loop header
LB: loop body
LE: loop exit
PB: predicated region body
PF: predicated region fallthrough
CT: control target
= control target key end

     0   :  { %8 = vsyncpa [#allocation3], 0  ;;  %s715_s0 = inlined_call_operand.hbm [shape: bf16[2,4,256], index: 0, kind: input, shape index: {}]   ;;  %s716_s1 = inlined_call_operand.vmem [shape: bf16[4,4], index: 1, kind: input, shape index: {}]   ;;  %s717_s2 = inlined_call_operand.vmem [shape: f32[4,1], index: 2, kind: input, shape index: {}]   ;;  %s718_s3 = inlined_call_operand.hbm [shape: bf16[2,4,256], index: 3, kind: output, shape index: {}]  }
   0x1   :  { %10 = vsyncpa [#allocation3 + $0x1], 0 }
   0x2   :  { %11 = vsyncpa [#allocation4], 0 }
   0x3   :  { %13 = vsyncpa [#allocation4 + $0x1], 0  ;;  %s586_s12 = smov 0   ;;  %s588_s13 = smov 0  }
   0x4   :  { %s590_s14 = smov 0   ;;  %s592_s15 = smov 0  }
   0x5   :  { %s594_s16 = smov 0   ;;  %s596_s17 = smov 0  }
   0x6 LB: > { %s368_s18 = sadd.s32 4294967295, %s563_s17   ;;  %s369_s19 = sadd.s32 4294967294, %s563_s17   ;;  %s563_s17 = sphi %s596_s17, %s19_s17   ;;  %s559_s16 = sphi %s594_s16, %s727_s16   ;;  %s555_s15 = sphi %s592_s15, %s726_s15   ;;  %s551_s14 = sphi %s590_s14, %s725_s14   ;;  %s547_s13 = sphi %s588_s13, %s724_s13   ;;  %s543_s12 = sphi %s586_s12, %s723_s12  }
   0x7   : > { %s31_s20 = sadd.s32 1, %s559_s16  ;;  %s40_s21 = sadd.s32 1, %s551_s14 }
   0x8   : > { %p33_p0 = scmp.ge.s32.totalorder %s31_s20, 2  ;;  %p47_p1 = scmp.ne.s32.totalorder %s551_s14, %s547_s13 }
   0x9   : > { %p48_p2 = scmp.eq.s32.totalorder %s563_s17, 0  ;;  %p53_p3 = scmp.ne.s32.totalorder %s547_s13, %s543_s12 }
   0xa   : > { %s729_s20 = smov (%p33_p0, %s31_s20), 0  ;;  %p54_p5 = scmp.eq.s32.totalorder %s368_s18, 0 }
   0xb   : > { %p627_p4 = por %p48_p2, %p47_p1  ;;  %s35_s23 = ssub.s32 %s559_s16, %s729_s20 }
   0xc   : > { %p121_p6 = scmp.eq.s32.totalorder %s368_s18, 1  ;;  %p38_p7 = scmp.eq.s32.totalorder %s35_s23, 0 }
   0xd   : > { %p633_p8 = por %p54_p5, %p53_p3  ;;  %p127_p10 = scmp.eq.s32.totalorder %s369_s19, 1 }
   0xe   : > { %p637_p9 = por %p121_p6, %p47_p1  ;;  %p371_p12 = scmp.ge.s32.totalorder %s563_s17, 2 }
   0xf   : > { %s642_s26 = scalar_select %p38_p7, %s551_s14, %s40_s21  }
  0x10   : > { %p644_p11 = por %p127_p10, %p53_p3  ;;  %p399_p13 = scmp.lt.s32.totalorder %s563_s17, 2 }
  0x11   : > { %s153_s28 = sand.u32 1, %s551_s14   ;;  %s385_s30 = sshll.u32 %s559_s16, 2 }
  0x12   : > { %s372_s29 = sshll.u32 %s153_s28, 2  ;;  %s164_s6 = scalar_lea.hbm %s715_s0, %s385_s30 }
  0x13   : > { %s157_s7 = scalar_lea.vmem [#allocation2], %s372_s29  ;;  %s166_s9 = sshll.u32 %s164_s6, 4  ;;  %s167_s9 = int_to_ptr.hbm [resolvable:$true] %s166_s9 }
  0x14   : > { %s168_s8 = sshll.u32 %s157_s7, 4  ;;  %p392_p0 = pnand %p399_p13, %p627_p4  ;;  %s169_s8 = int_to_ptr.vmem [resolvable:$true] %s168_s8 }
  0x15   : > { %p375_p1 = scmp.ge.s32.totalorder %s563_s17, 1  ;;  %p173_p2 = scmp.lt.s32.totalorder %s563_s17, 3 }
  0x16   : > { %s154_s10 = scalar_lea.sflag [#allocation3], %s153_s28 }
  0x17   : > { %394 = dma.hbm_to_vmem [thread:$0]  (!%p392_p0), %s167_s9, 64, %s169_s8, %s154_s10  }
  0x18   : > { %p174_p3 = pnand %p375_p1, %p173_p2 }
  0x19   : > { %s660_s11 = sand.u32 (!%p174_p3), 1, %s547_s13  }
  0x1a   : > { %177 = sbr.rel (%p174_p3) target bundleno = 181 (0xb5), region = 32  ;;  %s376_s18 = sshll.u32 (!%p174_p3), %s660_s11, 2 }
  0x1b   : > { %s180_s19 = scalar_lea.sflag (!%p174_p3), [#allocation3], %s660_s11  ;;  %s183_s21 = scalar_lea.vmem (!%p174_p3), [#allocation2], %s376_s18 }
  0x1f   : > { %534 = dma.done.wait (%p633_p8), %s180_s19, 64  }
  0x20   : > { %536 = vsyncadd (%p633_p8), %s180_s19, 4294967232  ;;  %v565_v0 = vmov 0   ;;  %v211_v1 = vld [vmem:[%s183_s21] sm:$0xf]  ;;  %v212_v2 = vld [vmem:[%s717_s2] sm:$0xf] }
  0x21   : > { %450 = vset.pattern.permute.xlu0 %v565_v0  ;;  %219 = vst [vmem:[#allocation1] ss:$4 sm:$0xff] %v211_v1  ;;  %vm226_vm0 = vcmask 1041408   ;;  %v210_v7 = vld [vmem:[%s716_s1] sm:$0x3]  ;;  %vm222_vm1 = vcmask 31744  }
  0x22   : > { %215 = vperm.xlu0 %450, %v212_v2   ;;  %s386_s29 = sshll.u32 %s555_s15, 2  ;;  %s206_s6 = scalar_lea.vmem [#allocation5], %s376_s18 }
  0x23   : > { %s279_s5 = scalar_lea.hbm %s718_s3, %s386_s29  ;;  %s281_s7 = sshll.u32 %s206_s6, 4  ;;  %s282_s7 = int_to_ptr.vmem [resolvable:$true] %s281_s7 }
  0x24   : > { %s283_s8 = sshll.u32 %s279_s5, 4  ;;  %s266_s15 = scalar_lea.sflag [#allocation4], %s660_s11  ;;  %s284_s8 = int_to_ptr.hbm [resolvable:$true] %s283_s8 }
  0x25   : > { %s495_s9 = sshra.s32 %s284_s8, 4  ;;  %s501_s21 = scalar_lea.hbm %s718_s3, 8  ;;  %s496_s9 = int_to_ptr.hbm [resolvable:$true] %s495_s9 }
  0x26   : > { %s497_s10 = scalar_lea.hbm %s496_s9, 4  ;;  %p502_p7 = scmp.lt.s32.totalorder %s496_s9, %s718_s3 }
  0x27   : > { %p498_p4 = scmp.ne.s32.totalorder %s496_s9, %s497_s10  ;;  %p503_p8 = scmp.lt.s32.totalorder %s501_s21, %s497_s10 }
  0x28   : > { %v220_v3 = vld.sshfl [vmem:[#allocation1] sm:$0xff pattern:$0x73625140]  ;;  %v221_v4 = vld.sshfl [vmem:[#allocation1 + $0x8] sm:$0xff pattern:$0x73625140] }
  0x29   : > { %v227_v5 = vsel %vm226_vm0, %v220_v3, 0  ;;  %v229_v6 = vsel %vm226_vm0, %v221_v4, 0  ;;  %p499_p5 = pnand %p498_p4, %p637_p9  ;;  %p504_p10 = por %p503_p8, %p502_p7 }
  0x2a   : > { %238 = vmatpush.bf16.msra.mxu0 %v227_v5  ;;  %251 = vmatpush.bf16.msra.mxu1 %v229_v6 }
  0x2b   : > { %p500_p6 = pneg %p499_p5 }
  0x2d   : > { %378 = vmatmul.msk.bf16.vlgmr.msra.gmra.mxu0 %vm222_vm1, %v210_v7  ;;  %379 = vmatmul.msk.bf16.vlgmr.msra.gmra.mxu1 %vm222_vm1, %v210_v7  ;;  %p505_p13 = pnand %p504_p10, %p500_p6 }
  0x94   : > { %v216_v8 = vpop.permute.xlu0 %215 }
  0xaa   : > { %v240_v9 = vpop.f32.mrf.mxu0  ;;  %v253_v10 = vpop.f32.mrf.mxu1 }
  0xab   : > { %v241_v11 = vadd.f32 %v240_v9, %v216_v8  ;;  %v254_v12 = vadd.f32 %v253_v10, %v216_v8 }
  0xad   : > { %v257_v13 = vpack.c.bf16 %v254_v12, %v241_v11 }
  0xaf   : > { %v259_v14 = vrot.slane %v257_v13, 2 }
  0xb1   : > { %v262_v15 = vsel %vm226_vm0, %v257_v13, %v259_v14 }
  0xb2   : > { %v242_v16 = vpop.f32.mrf.mxu0  ;;  %v255_v17 = vpop.f32.mrf.mxu1  ;;  %264 = vst [vmem:[%s206_s6] sm:$0xf] %v262_v15 }
  0xb3   : > { %508 = shalt.err (!%p505_p13)
}
  0xb4   : > { %389 = dma.vmem_to_hbm [thread:$0]  (%p637_p9), %s282_s7, 64, %s284_s8, %s266_s15  }
  0xb5 PF: > { %s295_s11 = sand.u32 1, %s543_s12   ;;  %p396_p0 = pnand %p371_p12, %p644_p11 }
  0xb6   : > { %s296_s24 = scalar_lea.sflag [#allocation4], %s295_s11 }
  0xb7   : > { %p397_p1 = pneg %p396_p0 }
  0xb9   : > { %538 = dma.done.wait (%p397_p1), %s296_s24, 64  }
  0xba   : > { %540 = vsyncadd (%p397_p1), %s296_s24, 4294967232  ;;  %s19_s17 = sadd.s32 1, %s563_s17   ;;  %s723_s12 = smov %s547_s13 }
  0xbb   : > { %p16_p2 = scmp.ge.s32.totalorder %s19_s17, 4   ;;  %s724_s13 = smov %s551_s14 }
  0xbc   : > { %s725_s14 = smov %s642_s26  ;;  %s726_s15 = smov %s559_s16 }
  0xbd   : > { %s727_s16 = smov %s729_s20  ;;  %18 = sbr.rel (!%p16_p2) target bundleno = 6 (0x6), region = 77 }
  0xc2   :  { %302 = vsyncpa [#allocation3], 1 }
  0xc3   :  { %304 = vsyncpa [#allocation3 + $0x1], 1 }
  0xc4   :  { %305 = vsyncpa [#allocation4], 1 }
  0xc5   :  { %307 = vsyncpa [#allocation4 + $0x1], 1 }

</bundles_post_ra>
